<compile_context>
chip_gen: v5e
topology: v5e:2x2
jax: 0.10.0
libtpu: 0.0.40
codegen_flags: <defaults>
</compile_context>

<pallas_src>
import functools

import jax
import jax.numpy as jnp
from jax import lax
from jax.experimental import pallas as pl
from jax.experimental.pallas import tpu as pltpu


def _fold_sublanes_to_8(x):
    """Sum an (S, 128) f32 slab down to (8, 128) using aligned vreg adds only.

    S must be a multiple of 8; every slice start is a multiple of 8 sublanes
    so no (8, 128) tile is split.  Tree-fold keeps the add chain log-depth.
    """
    s = x.shape[0]
    while s > 8 and s % 16 == 0:
        s //= 2
        x = x[:s] + x[s:]
    if x.shape[0] > 8:
        acc = x[0:8]
        for k in range(1, x.shape[0] // 8):
            acc = acc + x[k * 8:(k + 1) * 8]
        x = acc
    return x


def _focal_kernel(preds_ref, labels_ref, out_ref, *,
                  alpha_vals, gamma, n_rows, tile_rows, has_pad):
    i = pl.program_id(0)

    labels = labels_ref[...]                                  # (S, 128) int32
    C = preds_ref.shape[0]

    # Per-class lane-dense planes; all intermediates are dense (S, 128).
    planes = [preds_ref[c].astype(jnp.float32) for c in range(C)]

    # Numerically-stable log-softmax over classes, purely elementwise.
    m = planes[0]
    for c in range(1, C):
        m = jnp.maximum(m, planes[c])
    shifted = [p - m for p in planes]
    exps = [jnp.exp(sh) for sh in shifted]                    # C EUP exps
    denom = exps[0]
    for c in range(1, C):
        denom = denom + exps[c]
    log_denom = jnp.log(denom)

    # Gather the label class with nested selects; reuse the exp planes so pt
    # needs no second exp:  pt = exp(shifted_at_label) / denom  (exact divide).
    shifted_at_label = shifted[C - 1]
    exp_at_label = exps[C - 1]
    for c in range(C - 2, -1, -1):
        is_c = labels == c
        shifted_at_label = jnp.where(is_c, shifted[c], shifted_at_label)
        exp_at_label = jnp.where(is_c, exps[c], exp_at_label)
    logpt = shifted_at_label - log_denom                      # (S, 128)
    pt = exp_at_label / denom                                  # (S, 128)

    # alpha_t from compile-time scalars (no VMEM alpha operand).
    if C > 1 and len(set(alpha_vals[1:])) == 1:
        alpha_t = jnp.where(labels == 0,
                            jnp.float32(alpha_vals[0]),
                            jnp.float32(alpha_vals[1]))
    else:
        alpha_t = jnp.full(labels.shape, alpha_vals[-1], dtype=jnp.float32)
        for c in range(C - 2, -1, -1):
            alpha_t = jnp.where(labels == c, jnp.float32(alpha_vals[c]), alpha_t)

    # (1 - pt) ** gamma — integer gamma becomes repeated multiplies.
    one_minus_pt = 1.0 - pt
    if float(gamma) == int(gamma) and gamma >= 0:
        g = int(gamma)
        w = jnp.ones_like(one_minus_pt) if g == 0 else one_minus_pt
        for _ in range(max(g - 1, 0)):
            w = w * one_minus_pt
    else:
        w = jnp.power(one_minus_pt, jnp.float32(gamma))

    per_row = -(alpha_t * w * logpt)                          # (S, 128)

    # Zero padded tail rows.  Compile-time gated: only emitted when padding
    # exists; for all but the last tile the select is an all-true no-op
    # (3 cheap VPU ops per vreg).
    if has_pad:
        row = (i * tile_rows
               + lax.broadcasted_iota(jnp.int32, per_row.shape, 0) * 128
               + lax.broadcasted_iota(jnp.int32, per_row.shape, 1))
        per_row = jnp.where(row < n_rows, per_row, 0.0)

    # Lane-dense (8, 128) partial sum for this tile.
    out_ref[...] = _fold_sublanes_to_8(per_row).reshape(out_ref.shape)


def focal_loss(preds, labels, *, alpha=0.25, gamma=2, num_classes=3,
               size_average=True, tile_rows=131072):
    """preds: [B, N, C] or [B, C] float logits; labels: [B, N] or [B] int."""
    C = preds.shape[-1]
    assert C == num_classes
    preds2d = preds.reshape(-1, C)                 # keep HBM dtype; upcast in-kernel
    labels1d = labels.reshape(-1).astype(jnp.int32)
    n_rows = preds2d.shape[0]

    # alpha as compile-time scalars: [alpha, 1-alpha, ...] or an explicit list.
    if isinstance(alpha, (list, tuple)):
        assert len(alpha) == num_classes
        alpha_vals = tuple(float(a) for a in alpha)
    else:
        assert alpha < 1
        alpha_vals = (float(alpha),) + (1.0 - float(alpha),) * (num_classes - 1)

    # VMEM cap: keep double-buffered (preds + labels) blocks well under the
    # 32 MiB default scoped limit (v7x physical VMEM is only 64 MiB/TC), so no
    # vmem_limit override is needed on any generation.
    itemsize = jnp.dtype(preds2d.dtype).itemsize
    bytes_per_row = C * itemsize + 4
    vmem_cap = max(1024, ((24 << 20) // (2 * bytes_per_row)) // 1024 * 1024)

    # Tiles are multiples of 1024 rows => S = tile//128 is a multiple of 8, so
    # blocks and the in-kernel fold stay (8, 128)-aligned.
    r128 = ((n_rows + 127) // 128) * 128
    max_tile = max(1024, (int(tile_rows) // 1024) * 1024)
    max_tile = min(max_tile, vmem_cap)
    n_tiles = pl.cdiv(r128, max_tile)
    if n_tiles == 1 and r128 >= 2048:
        n_tiles = 2            # keep both v7x TensorCores fed when possible
    tile = ((pl.cdiv(r128, n_tiles) + 1023) // 1024) * 1024
    n_tiles = pl.cdiv(r128, tile)
    r_padded = n_tiles * tile
    n_pad = r_padded - n_rows
    n_sub = r_padded // 128
    s_tile = tile // 128

    # Lane-dense class-major layout: (C, n_sub, 128); row r -> (r//128, r%128).
    # NOTE: this pad+transpose is an extra HBM round trip executed by XLA
    # before the kernel; if the producer can emit class-major logits (or bf16
    # logits), feed them here directly to halve end-to-end HBM traffic.
    preds_t = jnp.pad(preds2d, ((0, n_pad), (0, 0))).T.reshape(C, n_sub, 128)
    labels3d = jnp.pad(labels1d, ((0, n_pad),)).reshape(n_sub, 128)

    kernel = functools.partial(_focal_kernel, alpha_vals=alpha_vals,
                               gamma=float(gamma), n_rows=n_rows,
                               tile_rows=tile, has_pad=n_pad > 0)

    partials = pl.pallas_call(
        kernel,
        out_shape=jax.ShapeDtypeStruct((n_tiles, 8, 128), jnp.float32),
        grid_spec=pltpu.PrefetchScalarGridSpec(
            num_scalar_prefetch=0,
            grid=(n_tiles,),
            in_specs=[
                pl.BlockSpec((C, s_tile, 128), lambda i: (0, i, 0)),
                pl.BlockSpec((s_tile, 128), lambda i: (i, 0)),
            ],
            out_specs=pl.BlockSpec((1, 8, 128), lambda i: (i, 0, 0)),
        ),
        compiler_params=pltpu.CompilerParams(
            dimension_semantics=("parallel",)),
    )(preds_t, labels3d)

    total = jnp.sum(partials)
    if size_average:
        return total / jnp.float32(n_rows)
    return total


def _reference(preds, labels, alpha=0.25, gamma=2.0, num_classes=3,
               size_average=True):
    C = preds.shape[-1]
    preds2d = preds.reshape(-1, C).astype(jnp.float32)
    labels1d = labels.reshape(-1).astype(jnp.int32)
    if isinstance(alpha, (list, tuple)):
        alpha_vec = jnp.asarray(alpha, dtype=jnp.float32)
    else:
        alpha_vec = jnp.concatenate([
            jnp.asarray([alpha], dtype=jnp.float32),
            jnp.full((num_classes - 1,), 1.0 - alpha, dtype=jnp.float32),
        ])
    p = jax.nn.softmax(preds2d, axis=1)
    logp = jax.nn.log_softmax(preds2d, axis=1)
    idx = jnp.arange(preds2d.shape[0])
    pt = p[idx, labels1d]
    logpt = logp[idx, labels1d]
    a_t = alpha_vec[labels1d]
    loss = -a_t * (1.0 - pt) ** gamma * logpt
    return jnp.mean(loss) if size_average else jnp.sum(loss)


if __name__ == "__main__":
    key = jax.random.PRNGKey(0)
    k1, k2 = jax.random.split(key)
    B, N, C = 2, 8, 3                       # [B, N, C] detection-style preds
    preds = jax.random.normal(k1, (B, N, C), dtype=jnp.float32)
    labels = jax.random.randint(k2, (B, N), 0, C, dtype=jnp.int32)

    out_mean = focal_loss(preds, labels, alpha=0.25, gamma=2, num_classes=C,
                          size_average=True)
    out_mean = jax.block_until_ready(out_mean)
    ref_mean = _reference(preds, labels, size_average=True)
    assert jnp.allclose(out_mean, ref_mean, rtol=1e-5, atol=1e-6), (out_mean, ref_mean)

    out_sum = focal_loss(preds, labels, alpha=0.25, gamma=2, num_classes=C,
                         size_average=False)
    out_sum = jax.block_until_ready(out_sum)
    ref_sum = _reference(preds, labels, size_average=False)
    assert jnp.allclose(out_sum, ref_sum, rtol=1e-5, atol=1e-6), (out_sum, ref_sum)

    print("KERNEL_OK")
</pallas_src>

<mosaic_0001>
module attributes {stable_mosaic.version = 11 : i64} {
  func.func @_focal_kernel(%arg0: i32, %arg1: memref<3x8x128xf32, #tpu.memory_space<vmem>>, %arg2: memref<8x128xi32, #tpu.memory_space<vmem>>, %arg3: memref<1x8x128xf32, #tpu.memory_space<vmem>>) attributes {dimension_semantics = [#tpu.dimension_semantics<parallel>], iteration_bounds = array<i64: 1>, scalar_prefetch = 0 : i64, scratch_operands = 0 : i64, tpu.core_type = #tpu.core_type<tc>, window_params = [{transform_indices = @transform_0, window_bounds = array<i64: 3, 8, 128>}, {transform_indices = @transform_1, window_bounds = array<i64: 8, 128>}, {transform_indices = @transform_2, window_bounds = array<i64: 1, 8, 128>}]} {
    %c0 = arith.constant 0 : index
    %c0_0 = arith.constant 0 : index
    %0 = vector.load %arg2[%c0, %c0_0] : memref<8x128xi32, #tpu.memory_space<vmem>>, vector<8x128xi32>
    %c0_1 = arith.constant 0 : index
    %c0_2 = arith.constant 0 : index
    %c0_3 = arith.constant 0 : index
    %1 = vector.load %arg1[%c0_1, %c0_2, %c0_3] : memref<3x8x128xf32, #tpu.memory_space<vmem>>, vector<1x8x128xf32>
    %2 = vector.shape_cast %1 : vector<1x8x128xf32> to vector<8x128xf32>
    %c1 = arith.constant 1 : index
    %c0_4 = arith.constant 0 : index
    %c0_5 = arith.constant 0 : index
    %3 = vector.load %arg1[%c1, %c0_4, %c0_5] : memref<3x8x128xf32, #tpu.memory_space<vmem>>, vector<1x8x128xf32>
    %4 = vector.shape_cast %3 : vector<1x8x128xf32> to vector<8x128xf32>
    %c2 = arith.constant 2 : index
    %c0_6 = arith.constant 0 : index
    %c0_7 = arith.constant 0 : index
    %5 = vector.load %arg1[%c2, %c0_6, %c0_7] : memref<3x8x128xf32, #tpu.memory_space<vmem>>, vector<1x8x128xf32>
    %6 = vector.shape_cast %5 : vector<1x8x128xf32> to vector<8x128xf32>
    %7 = arith.maximumf %2, %4 : vector<8x128xf32>
    %8 = arith.maximumf %7, %6 : vector<8x128xf32>
    %9 = arith.subf %2, %8 : vector<8x128xf32>
    %10 = arith.subf %4, %8 : vector<8x128xf32>
    %11 = arith.subf %6, %8 : vector<8x128xf32>
    %12 = math.exp %9 : vector<8x128xf32>
    %13 = math.exp %10 : vector<8x128xf32>
    %14 = math.exp %11 : vector<8x128xf32>
    %15 = arith.addf %12, %13 : vector<8x128xf32>
    %16 = arith.addf %15, %14 : vector<8x128xf32>
    %17 = math.log %16 : vector<8x128xf32>
    %c1_i32 = arith.constant 1 : i32
    %18 = vector.broadcast %c1_i32 : i32 to vector<8x128xi32>
    %19 = arith.cmpi eq, %0, %18 : vector<8x128xi32>
    %20 = arith.select %19, %10, %11 : vector<8x128xi1>, vector<8x128xf32>
    %21 = arith.select %19, %13, %14 : vector<8x128xi1>, vector<8x128xf32>
    %c0_i32 = arith.constant 0 : i32
    %22 = vector.broadcast %c0_i32 : i32 to vector<8x128xi32>
    %23 = arith.cmpi eq, %0, %22 : vector<8x128xi32>
    %24 = arith.select %23, %9, %20 : vector<8x128xi1>, vector<8x128xf32>
    %25 = arith.select %23, %12, %21 : vector<8x128xi1>, vector<8x128xf32>
    %26 = arith.subf %24, %17 : vector<8x128xf32>
    %27 = arith.divf %25, %16 : vector<8x128xf32>
    %c0_i32_8 = arith.constant 0 : i32
    %28 = vector.broadcast %c0_i32_8 : i32 to vector<8x128xi32>
    %29 = arith.cmpi eq, %0, %28 : vector<8x128xi32>
    %cst = arith.constant 2.500000e-01 : f32
    %cst_9 = arith.constant 7.500000e-01 : f32
    %30 = vector.broadcast %cst : f32 to vector<8x128xf32>
    %31 = vector.broadcast %cst_9 : f32 to vector<8x128xf32>
    %32 = arith.select %29, %30, %31 : vector<8x128xi1>, vector<8x128xf32>
    %cst_10 = arith.constant 1.000000e+00 : f32
    %33 = vector.broadcast %cst_10 : f32 to vector<8x128xf32>
    %34 = arith.subf %33, %27 : vector<8x128xf32>
    %35 = arith.mulf %34, %34 : vector<8x128xf32>
    %36 = arith.mulf %32, %35 : vector<8x128xf32>
    %37 = arith.mulf %36, %26 : vector<8x128xf32>
    %cst_11 = arith.constant 0.000000e+00 : f32
    %38 = vector.broadcast %cst_11 : f32 to vector<8x128xf32>
    %39 = arith.subf %38, %37 : vector<8x128xf32>
    %c1024_i32 = arith.constant 1024 : i32
    %40 = arith.muli %arg0, %c1024_i32 : i32
    %41 = tpu.iota {dimensions = array<i32: 0>} : vector<8x128xi32>
    %c128_i32 = arith.constant 128 : i32
    %42 = vector.broadcast %c128_i32 : i32 to vector<8x128xi32>
    %43 = arith.muli %41, %42 : vector<8x128xi32>
    %44 = vector.broadcast %40 : i32 to vector<8x128xi32>
    %45 = arith.addi %44, %43 : vector<8x128xi32>
    %46 = tpu.iota {dimensions = array<i32: 1>} : vector<8x128xi32>
    %47 = arith.addi %45, %46 : vector<8x128xi32>
    %c16_i32 = arith.constant 16 : i32
    %48 = vector.broadcast %c16_i32 : i32 to vector<8x128xi32>
    %49 = arith.cmpi slt, %47, %48 : vector<8x128xi32>
    %cst_12 = arith.constant 0.000000e+00 : f32
    %50 = vector.broadcast %cst_12 : f32 to vector<8x128xf32>
    %51 = arith.select %49, %39, %50 : vector<8x128xi1>, vector<8x128xf32>
    %52 = vector.shape_cast %51 : vector<8x128xf32> to vector<1x8x128xf32>
    %c0_13 = arith.constant 0 : index
    %c0_14 = arith.constant 0 : index
    %c0_15 = arith.constant 0 : index
    %53 = vector.load %arg3[%c0_13, %c0_14, %c0_15] : memref<1x8x128xf32, #tpu.memory_space<vmem>>, vector<1x8x128xf32>
    tpu.vector_store %arg3[%c0_13, %c0_14, %c0_15], %52 {strides = array<i32>} : memref<1x8x128xf32, #tpu.memory_space<vmem>>, vector<1x8x128xf32>,
    return
  }
  func.func @transform_0(%arg0: i32) -> (i32, i32, i32) {
    %c0_i32 = arith.constant 0 : i32
    %c0_i32_0 = arith.constant 0 : i32
    %c0_i32_1 = arith.constant 0 : i32
    return %c0_i32, %arg0, %c0_i32_0 : i32, i32, i32
  }
  func.func @transform_1(%arg0: i32) -> (i32, i32) {
    %c0_i32 = arith.constant 0 : i32
    %c0_i32_0 = arith.constant 0 : i32
    return %arg0, %c0_i32 : i32, i32
  }
  func.func @transform_2(%arg0: i32) -> (i32, i32, i32) {
    %c0_i32 = arith.constant 0 : i32
    %c0_i32_0 = arith.constant 0 : i32
    %c0_i32_1 = arith.constant 0 : i32
    return %arg0, %c0_i32, %c0_i32_0 : i32, i32, i32
  }
}

</mosaic_0001>

<bundles_post_ra>
// kernel: tpu_custom_call.1
= control target key start
LH: loop header
LB: loop body
LE: loop exit
PB: predicated region body
PF: predicated region fallthrough
CT: control target
= control target key end

     0   :  { %7 = vsyncpa [#allocation3], 0  ;;  %s250_s0 = inlined_call_operand.hbm [shape: f32[3,8,128], index: 0, kind: input, shape index: {}]   ;;  %s251_s1 = inlined_call_operand.hbm [shape: s32[8,128], index: 1, kind: input, shape index: {}]   ;;  %s252_s2 = inlined_call_operand.hbm [shape: f32[1,8,128], index: 2, kind: output, shape index: {}]  }
   0x1   :  { %8 = vsyncpa [#allocation6], 0 }
   0x2   :  { %9 = vsyncpa [#allocation4], 0  ;;  %s14_s11 = sshll.u32 %s250_s0, 4  ;;  %s215_s12 = smov [#allocation2]   ;;  %s15_s11 = int_to_ptr.hbm [resolvable:$true] %s14_s11 }
   0x3   :  { %s16_s13 = sshll.u32 %s215_s12, 4  ;;  %s28_s16 = sshll.u32 %s251_s1, 4  ;;  %s17_s13 = int_to_ptr.vmem [resolvable:$true] %s16_s13  ;;  %s29_s16 = int_to_ptr.hbm [resolvable:$true] %s28_s16 }
   0x4   :  { %s216_s17 = smov 128   ;;  %s217_s18 = smov 8  }
   0x5   :  { %22 = dma.hbm_to_vmem [thread:$0]  %s15_s11, 384, %s17_s13, [#allocation3], %s216_s17, %s216_s17, %s217_s18  }
   0x6   :  { %s218_s19 = smov [#allocation5]  }
   0x7   :  { %s30_s20 = sshll.u32 %s218_s19, 4  ;;  %s31_s20 = int_to_ptr.vmem [resolvable:$true] %s30_s20 }
   0x8   :  { %33 = dma.hbm_to_vmem [thread:$0]  %s29_s16, 128, %s31_s20, [#allocation6]  }
   0x9   :  { %209 = dma.done.wait [#allocation3], 384  }
   0xa   :  { %210 = vsyncadd [#allocation3], 4294966912 }
   0xb   :  { %211 = dma.done.wait [#allocation6], 128  }
   0xc   :  { %212 = vsyncadd [#allocation6], 4294967168  ;;  %v43_v0 = vld [vmem:[#allocation2] sm:$0xff]  ;;  %v45_v1 = vld [vmem:[#allocation2 + $0x8] sm:$0xff]  ;;  %v92_v22 = vlaneseq  ;;  %v219_v39 = vmov 0.75   ;;  %s220_s0 = smov [#allocation7]  }
   0xd   :  { %v47_v2 = vld [vmem:[#allocation2 + $0x10] sm:$0xff]  ;;  %v48_v3 = vmax.f32 %v43_v0, %v45_v1  ;;  %v42_v16 = vld [vmem:[#allocation5] sm:$0xff]  ;;  %s108_s1 = sshll.u32 %s220_s0, 4  ;;  %s110_s23 = sshll.u32 %s252_s2, 4  ;;  %s109_s1 = int_to_ptr.vmem [resolvable:$true] %s108_s1  ;;  %s111_s23 = int_to_ptr.hbm [resolvable:$true] %s110_s23 }
   0xe   :  { %vm63_vm0 = vcmp.eq.s32.totalorder %v42_v16, 1  ;;  %vm66_vm3 = vcmp.eq.s32.totalorder %v42_v16, 0  ;;  %v93_v29 = vshrl.u32 %v92_v22, 7  ;;  %v98_v37 = vand.u32 127, %v92_v22 }
   0xf   :  { %v49_v4 = vmax.f32 %v48_v3, %v47_v2  ;;  %v85_v40 = vsel %vm66_vm3, 0.25, %v219_v39 }
  0x10   :  { %v94_v36 = vmul.u32 128, %v93_v29 }
  0x11   :  { %v50_v5 = vsub.f32 %v43_v0, %v49_v4  ;;  %v51_v6 = vsub.f32 %v45_v1, %v49_v4  ;;  %v52_v7 = vsub.f32 %v47_v2, %v49_v4 }
  0x12   :  { %v99_v43 = vadd.s32 %v98_v37, %v94_v36 }
  0x13   :  { %v53_v8 = vmul.f32 1.442695, %v50_v5  ;;  %v55_v9 = vmul.f32 1.442695, %v51_v6  ;;  %v57_v10 = vmul.f32 1.442695, %v52_v7  ;;  %v64_v30 = vsel %vm63_vm0, %v51_v6, %v52_v7 }
  0x14   :  { %v67_v35 = vsel %vm66_vm3, %v50_v5, %v64_v30  ;;  %vm100_vm6 = vcmp.lt.s32.totalorder %v99_v43, 16 }
  0x15   :  { %127 = vpow2.f32 %v53_v8 }
  0x16   :  { %129 = vpow2.f32 %v55_v9 }
  0x17   :  { %131 = vpow2.f32 %v57_v10 }
  0x1b   :  { %v128_v11 = vpop.eup %127 }
  0x1c   :  { %v130_v12 = vpop.eup %129 }
  0x1d   :  { %v132_v13 = vpop.eup %131  ;;  %v59_v14 = vadd.f32 %v130_v12, %v128_v11 }
  0x1e   :  { %v65_v23 = vsel %vm63_vm0, %v130_v12, %v132_v13 }
  0x1f   :  { %v60_v15 = vadd.f32 %v132_v13, %v59_v14  ;;  %v68_v28 = vsel %vm66_vm3, %v128_v11, %v65_v23 }
  0x21   :  { %133 = vrcp.f32 %v60_v15  ;;  %v81_v19 = vand.u32 2147483648, %v60_v15  ;;  %vm75_vm1 = vweird.f32 %v60_v15  ;;  %v79_v21 = vand.u32 2147483647, %v60_v15 }
  0x22   :  { %135 = vlog2.f32 %v60_v15 }
  0x23   :  { %v82_v25 = vor.u32 1.1754944e-38, %v81_v19  ;;  %vm80_vm5 = vcmp.eq.f32.partialorder %v79_v21, 8.507059e+37 }
  0x27   :  { %v134_v17 = vpop.eup %133 }
  0x28   :  { %v71_v18 = vmul.f32 %v134_v17, %v60_v15  ;;  %vm76_vm2 = vweird.f32 %v134_v17  ;;  %v136_v27 = vpop.eup %135 }
  0x29   :  { %vm77_vm4 = vmor %vm75_vm1, %vm76_vm2  ;;  %v62_v33 = vmul.f32 0.6931472, %v136_v27 }
  0x2a   :  { %v72_v20 = vsub.f32 1.0, %v71_v18 }
  0x2b   :  { %v69_v41 = vsub.f32 %v67_v35, %v62_v33 }
  0x2c   :  { %v73_v24 = vmul.f32 %v134_v17, %v72_v20 }
  0x2e   :  { %v74_v26 = vadd.f32 %v134_v17, %v73_v24 }
  0x30   :  { %v78_v31 = vsel %vm77_vm4, %v134_v17, %v74_v26 }
  0x31   :  { %v83_v32 = vsel %vm80_vm5, %v82_v25, %v78_v31 }
  0x32   :  { %v84_v34 = vmul.f32 %v83_v32, %v68_v28 }
  0x34   :  { %v86_v38 = vsub.f32 1.0, %v84_v34 }
  0x36   :  { %v87_v42 = vmul.f32 %v86_v38, %v86_v38 }
  0x38   :  { %v88_v44 = vmul.f32 %v87_v42, %v85_v40 }
  0x3a   :  { %v89_v45 = vmul.f32 %v88_v44, %v69_v41 }
  0x3c   :  { %v90_v46 = vsub.f32 0.0, %v89_v45 }
  0x3e   :  { %v101_v47 = vsel %vm100_vm6, %v90_v46, 0.0 }
  0x3f   :  { %102 = vst [vmem:[#allocation7] sm:$0xff] %v101_v47 }
  0x40   :  { %113 = dma.vmem_to_hbm [thread:$0]  %s109_s1, 128, %s111_s23, [#allocation4]  }
  0x41   :  { %213 = dma.done.wait [#allocation4], 128  }
  0x42   :  { %214 = vsyncadd [#allocation4], 4294967168 }
  0x43   :  { %118 = vsyncpa [#allocation3], 1 }
  0x44   :  { %119 = vsyncpa [#allocation6], 1 }
  0x45   :  { %120 = vsyncpa [#allocation4], 1 }

</bundles_post_ra>
